<compile_context>
chip_gen: v7x
topology: tpu7x:2x2x1
jax: 0.10.0
libtpu: 0.0.40
codegen_flags: <defaults>
</compile_context>

<pallas_src>
import jax
import jax.numpy as jnp
from jax.experimental import pallas as pl
from jax.experimental.pallas import tpu as pltpu

# logical dims (from the PyTorch module)
D_IN, D_HID, D_OUT = 2, 5, 3


def _round_up(x, m):
    return (x + m - 1) // m * m


def mlp_kernel(x_ref, w1_ref, b1_ref, w2_ref, b2_ref, o_ref):
    # x_ref : (D_IN, TM)  VMEM tile, batch on lanes (lane-dense)
    # w1_ref: (D_HID*D_IN,) f32 SMEM (row-major W1), b1_ref: (D_HID,) SMEM
    # w2_ref: (D_OUT*D_HID,) f32 SMEM (row-major W2), b2_ref: (D_OUT,) SMEM
    # o_ref : (D_OUT, TM) VMEM tile, batch on lanes (lane-dense store)
    x0 = x_ref[0:1, :]                       # (1, TM)
    x1 = x_ref[1:2, :]                       # (1, TM)

    # Layer 1: Linear(2,5) + ReLU — scalar-from-SMEM * vector on the VPU.
    h = []
    for j in range(D_HID):
        hj = w1_ref[j * D_IN + 0] * x0 + w1_ref[j * D_IN + 1] * x1 + b1_ref[j]
        h.append(jnp.maximum(hj, 0.0))       # (1, TM)

    # Layer 2: Linear(5,3) + ReLU — same pattern.
    rows = []
    for i in range(D_OUT):
        acc = w2_ref[i * D_HID + 0] * h[0]
        for k in range(1, D_HID):
            acc = acc + w2_ref[i * D_HID + k] * h[k]
        rows.append(jnp.maximum(acc + b2_ref[i], 0.0))

    o_ref[...] = jnp.concatenate(rows, axis=0)   # (D_OUT, TM), one full store


def net_forward(x, w1, b1, w2, b2, *, tm=2048):
    """x: (B, 2) f32; PyTorch-convention params w1:(5,2), b1:(5,), w2:(3,5), b2:(3,)."""
    B = x.shape[0]
    # Batch tile: large enough to amortize per-step overhead, capped for tiny B.
    TM = min(tm, _round_up(B, 128))
    Bp = _round_up(B, TM)

    # Transpose once at the edge: batch -> lanes.  Only the ragged batch tail
    # is zero-padded (cheap); no feature-dim padding anywhere.
    xT = jnp.pad(x.astype(jnp.float32).T, ((0, 0), (0, Bp - B)))   # (D_IN, Bp)

    smem = pl.BlockSpec(memory_space=pltpu.MemorySpace.SMEM)

    out_t = pl.pallas_call(
        mlp_kernel,
        out_shape=jax.ShapeDtypeStruct((D_OUT, Bp), jnp.float32),
        grid=(Bp // TM,),
        in_specs=[
            pl.BlockSpec((D_IN, TM), lambda i: (0, i)),   # x tile walks batch
            smem,                                          # w1 (flat)
            smem,                                          # b1
            smem,                                          # w2 (flat)
            smem,                                          # b2
        ],
        out_specs=pl.BlockSpec((D_OUT, TM), lambda i: (0, i)),
        compiler_params=pltpu.CompilerParams(
            dimension_semantics=("parallel",)),            # v7x: 2 TCs share batch
    )(xT, w1.reshape(-1), b1, w2.reshape(-1), b2)

    # Strip batch padding and transpose back to (B, 3).
    return out_t[:, :B].T


def init_params(key):
    """Deterministic init mimicking PyTorch nn.Linear defaults (U(-1/sqrt(fan_in), +))."""
    k1, k2, k3, k4 = jax.random.split(key, 4)
    bound1 = 1.0 / jnp.sqrt(D_IN)
    bound2 = 1.0 / jnp.sqrt(D_HID)
    w1 = jax.random.uniform(k1, (D_HID, D_IN), jnp.float32, -bound1, bound1)
    b1 = jax.random.uniform(k2, (D_HID,), jnp.float32, -bound1, bound1)
    w2 = jax.random.uniform(k3, (D_OUT, D_HID), jnp.float32, -bound2, bound2)
    b2 = jax.random.uniform(k4, (D_OUT,), jnp.float32, -bound2, bound2)
    return w1, b1, w2, b2


if __name__ == "__main__":
    key = jax.random.PRNGKey(0)
    kx, kp = jax.random.split(key)
    B = 8
    x = jax.random.normal(kx, (B, D_IN), jnp.float32)
    w1, b1, w2, b2 = init_params(kp)

    out = jax.jit(net_forward)(x, w1, b1, w2, b2)
    out = jax.block_until_ready(out)

    # reference check in plain JAX
    ref = jnp.maximum(jnp.maximum(x @ w1.T + b1, 0.0) @ w2.T + b2, 0.0)
    assert out.shape == (B, D_OUT)
    assert jnp.allclose(out, ref, atol=1e-5, rtol=1e-5)

    print("KERNEL_OK")
</pallas_src>

<mosaic_0001>
module attributes {stable_mosaic.version = 11 : i64} {
  func.func @mlp_kernel(%arg0: i32, %arg1: memref<2x128xf32, #tpu.memory_space<vmem>>, %arg2: memref<10xf32, #tpu.memory_space<smem>>, %arg3: memref<5xf32, #tpu.memory_space<smem>>, %arg4: memref<15xf32, #tpu.memory_space<smem>>, %arg5: memref<3xf32, #tpu.memory_space<smem>>, %arg6: memref<3x128xf32, #tpu.memory_space<vmem>>) attributes {dimension_semantics = [#tpu.dimension_semantics<parallel>], iteration_bounds = array<i64: 1>, scalar_prefetch = 0 : i64, scratch_operands = 0 : i64, tpu.core_type = #tpu.core_type<tc>, window_params = [{transform_indices = @transform_0, window_bounds = array<i64: 2, 128>}, {transform_indices = @transform_1, window_bounds = array<i64: 10>}, {transform_indices = @transform_2, window_bounds = array<i64: 5>}, {transform_indices = @transform_3, window_bounds = array<i64: 15>}, {transform_indices = @transform_4, window_bounds = array<i64: 3>}, {transform_indices = @transform_5, window_bounds = array<i64: 3, 128>}]} {
    %c0 = arith.constant 0 : index
    %c0_0 = arith.constant 0 : index
    %0 = vector.load %arg1[%c0, %c0_0] : memref<2x128xf32, #tpu.memory_space<vmem>>, vector<1x128xf32>
    %c1 = arith.constant 1 : index
    %c0_1 = arith.constant 0 : index
    %1 = vector.load %arg1[%c1, %c0_1] : memref<2x128xf32, #tpu.memory_space<vmem>>, vector<1x128xf32>
    %c0_2 = arith.constant 0 : index
    %2 = memref.load %arg2[%c0_2] : memref<10xf32, #tpu.memory_space<smem>>
    %3 = vector.broadcast %2 : f32 to vector<1x128xf32>
    %4 = arith.mulf %3, %0 : vector<1x128xf32>
    %c1_3 = arith.constant 1 : index
    %5 = memref.load %arg2[%c1_3] : memref<10xf32, #tpu.memory_space<smem>>
    %6 = vector.broadcast %5 : f32 to vector<1x128xf32>
    %7 = arith.mulf %6, %1 : vector<1x128xf32>
    %8 = arith.addf %4, %7 : vector<1x128xf32>
    %c0_4 = arith.constant 0 : index
    %9 = memref.load %arg3[%c0_4] : memref<5xf32, #tpu.memory_space<smem>>
    %10 = vector.broadcast %9 : f32 to vector<1x128xf32>
    %11 = arith.addf %8, %10 : vector<1x128xf32>
    %cst = arith.constant 0.000000e+00 : f32
    %12 = vector.broadcast %cst : f32 to vector<1x128xf32>
    %13 = arith.maximumf %11, %12 : vector<1x128xf32>
    %c2 = arith.constant 2 : index
    %14 = memref.load %arg2[%c2] : memref<10xf32, #tpu.memory_space<smem>>
    %15 = vector.broadcast %14 : f32 to vector<1x128xf32>
    %16 = arith.mulf %15, %0 : vector<1x128xf32>
    %c3 = arith.constant 3 : index
    %17 = memref.load %arg2[%c3] : memref<10xf32, #tpu.memory_space<smem>>
    %18 = vector.broadcast %17 : f32 to vector<1x128xf32>
    %19 = arith.mulf %18, %1 : vector<1x128xf32>
    %20 = arith.addf %16, %19 : vector<1x128xf32>
    %c1_5 = arith.constant 1 : index
    %21 = memref.load %arg3[%c1_5] : memref<5xf32, #tpu.memory_space<smem>>
    %22 = vector.broadcast %21 : f32 to vector<1x128xf32>
    %23 = arith.addf %20, %22 : vector<1x128xf32>
    %cst_6 = arith.constant 0.000000e+00 : f32
    %24 = vector.broadcast %cst_6 : f32 to vector<1x128xf32>
    %25 = arith.maximumf %23, %24 : vector<1x128xf32>
    %c4 = arith.constant 4 : index
    %26 = memref.load %arg2[%c4] : memref<10xf32, #tpu.memory_space<smem>>
    %27 = vector.broadcast %26 : f32 to vector<1x128xf32>
    %28 = arith.mulf %27, %0 : vector<1x128xf32>
    %c5 = arith.constant 5 : index
    %29 = memref.load %arg2[%c5] : memref<10xf32, #tpu.memory_space<smem>>
    %30 = vector.broadcast %29 : f32 to vector<1x128xf32>
    %31 = arith.mulf %30, %1 : vector<1x128xf32>
    %32 = arith.addf %28, %31 : vector<1x128xf32>
    %c2_7 = arith.constant 2 : index
    %33 = memref.load %arg3[%c2_7] : memref<5xf32, #tpu.memory_space<smem>>
    %34 = vector.broadcast %33 : f32 to vector<1x128xf32>
    %35 = arith.addf %32, %34 : vector<1x128xf32>
    %cst_8 = arith.constant 0.000000e+00 : f32
    %36 = vector.broadcast %cst_8 : f32 to vector<1x128xf32>
    %37 = arith.maximumf %35, %36 : vector<1x128xf32>
    %c6 = arith.constant 6 : index
    %38 = memref.load %arg2[%c6] : memref<10xf32, #tpu.memory_space<smem>>
    %39 = vector.broadcast %38 : f32 to vector<1x128xf32>
    %40 = arith.mulf %39, %0 : vector<1x128xf32>
    %c7 = arith.constant 7 : index
    %41 = memref.load %arg2[%c7] : memref<10xf32, #tpu.memory_space<smem>>
    %42 = vector.broadcast %41 : f32 to vector<1x128xf32>
    %43 = arith.mulf %42, %1 : vector<1x128xf32>
    %44 = arith.addf %40, %43 : vector<1x128xf32>
    %c3_9 = arith.constant 3 : index
    %45 = memref.load %arg3[%c3_9] : memref<5xf32, #tpu.memory_space<smem>>
    %46 = vector.broadcast %45 : f32 to vector<1x128xf32>
    %47 = arith.addf %44, %46 : vector<1x128xf32>
    %cst_10 = arith.constant 0.000000e+00 : f32
    %48 = vector.broadcast %cst_10 : f32 to vector<1x128xf32>
    %49 = arith.maximumf %47, %48 : vector<1x128xf32>
    %c8 = arith.constant 8 : index
    %50 = memref.load %arg2[%c8] : memref<10xf32, #tpu.memory_space<smem>>
    %51 = vector.broadcast %50 : f32 to vector<1x128xf32>
    %52 = arith.mulf %51, %0 : vector<1x128xf32>
    %c9 = arith.constant 9 : index
    %53 = memref.load %arg2[%c9] : memref<10xf32, #tpu.memory_space<smem>>
    %54 = vector.broadcast %53 : f32 to vector<1x128xf32>
    %55 = arith.mulf %54, %1 : vector<1x128xf32>
    %56 = arith.addf %52, %55 : vector<1x128xf32>
    %c4_11 = arith.constant 4 : index
    %57 = memref.load %arg3[%c4_11] : memref<5xf32, #tpu.memory_space<smem>>
    %58 = vector.broadcast %57 : f32 to vector<1x128xf32>
    %59 = arith.addf %56, %58 : vector<1x128xf32>
    %cst_12 = arith.constant 0.000000e+00 : f32
    %60 = vector.broadcast %cst_12 : f32 to vector<1x128xf32>
    %61 = arith.maximumf %59, %60 : vector<1x128xf32>
    %c0_13 = arith.constant 0 : index
    %62 = memref.load %arg4[%c0_13] : memref<15xf32, #tpu.memory_space<smem>>
    %63 = vector.broadcast %62 : f32 to vector<1x128xf32>
    %64 = arith.mulf %63, %13 : vector<1x128xf32>
    %c1_14 = arith.constant 1 : index
    %65 = memref.load %arg4[%c1_14] : memref<15xf32, #tpu.memory_space<smem>>
    %66 = vector.broadcast %65 : f32 to vector<1x128xf32>
    %67 = arith.mulf %66, %25 : vector<1x128xf32>
    %68 = arith.addf %64, %67 : vector<1x128xf32>
    %c2_15 = arith.constant 2 : index
    %69 = memref.load %arg4[%c2_15] : memref<15xf32, #tpu.memory_space<smem>>
    %70 = vector.broadcast %69 : f32 to vector<1x128xf32>
    %71 = arith.mulf %70, %37 : vector<1x128xf32>
    %72 = arith.addf %68, %71 : vector<1x128xf32>
    %c3_16 = arith.constant 3 : index
    %73 = memref.load %arg4[%c3_16] : memref<15xf32, #tpu.memory_space<smem>>
    %74 = vector.broadcast %73 : f32 to vector<1x128xf32>
    %75 = arith.mulf %74, %49 : vector<1x128xf32>
    %76 = arith.addf %72, %75 : vector<1x128xf32>
    %c4_17 = arith.constant 4 : index
    %77 = memref.load %arg4[%c4_17] : memref<15xf32, #tpu.memory_space<smem>>
    %78 = vector.broadcast %77 : f32 to vector<1x128xf32>
    %79 = arith.mulf %78, %61 : vector<1x128xf32>
    %80 = arith.addf %76, %79 : vector<1x128xf32>
    %c0_18 = arith.constant 0 : index
    %81 = memref.load %arg5[%c0_18] : memref<3xf32, #tpu.memory_space<smem>>
    %82 = vector.broadcast %81 : f32 to vector<1x128xf32>
    %83 = arith.addf %80, %82 : vector<1x128xf32>
    %cst_19 = arith.constant 0.000000e+00 : f32
    %84 = vector.broadcast %cst_19 : f32 to vector<1x128xf32>
    %85 = arith.maximumf %83, %84 : vector<1x128xf32>
    %c5_20 = arith.constant 5 : index
    %86 = memref.load %arg4[%c5_20] : memref<15xf32, #tpu.memory_space<smem>>
    %87 = vector.broadcast %86 : f32 to vector<1x128xf32>
    %88 = arith.mulf %87, %13 : vector<1x128xf32>
    %c6_21 = arith.constant 6 : index
    %89 = memref.load %arg4[%c6_21] : memref<15xf32, #tpu.memory_space<smem>>
    %90 = vector.broadcast %89 : f32 to vector<1x128xf32>
    %91 = arith.mulf %90, %25 : vector<1x128xf32>
    %92 = arith.addf %88, %91 : vector<1x128xf32>
    %c7_22 = arith.constant 7 : index
    %93 = memref.load %arg4[%c7_22] : memref<15xf32, #tpu.memory_space<smem>>
    %94 = vector.broadcast %93 : f32 to vector<1x128xf32>
    %95 = arith.mulf %94, %37 : vector<1x128xf32>
    %96 = arith.addf %92, %95 : vector<1x128xf32>
    %c8_23 = arith.constant 8 : index
    %97 = memref.load %arg4[%c8_23] : memref<15xf32, #tpu.memory_space<smem>>
    %98 = vector.broadcast %97 : f32 to vector<1x128xf32>
    %99 = arith.mulf %98, %49 : vector<1x128xf32>
    %100 = arith.addf %96, %99 : vector<1x128xf32>
    %c9_24 = arith.constant 9 : index
    %101 = memref.load %arg4[%c9_24] : memref<15xf32, #tpu.memory_space<smem>>
    %102 = vector.broadcast %101 : f32 to vector<1x128xf32>
    %103 = arith.mulf %102, %61 : vector<1x128xf32>
    %104 = arith.addf %100, %103 : vector<1x128xf32>
    %c1_25 = arith.constant 1 : index
    %105 = memref.load %arg5[%c1_25] : memref<3xf32, #tpu.memory_space<smem>>
    %106 = vector.broadcast %105 : f32 to vector<1x128xf32>
    %107 = arith.addf %104, %106 : vector<1x128xf32>
    %cst_26 = arith.constant 0.000000e+00 : f32
    %108 = vector.broadcast %cst_26 : f32 to vector<1x128xf32>
    %109 = arith.maximumf %107, %108 : vector<1x128xf32>
    %c10 = arith.constant 10 : index
    %110 = memref.load %arg4[%c10] : memref<15xf32, #tpu.memory_space<smem>>
    %111 = vector.broadcast %110 : f32 to vector<1x128xf32>
    %112 = arith.mulf %111, %13 : vector<1x128xf32>
    %c11 = arith.constant 11 : index
    %113 = memref.load %arg4[%c11] : memref<15xf32, #tpu.memory_space<smem>>
    %114 = vector.broadcast %113 : f32 to vector<1x128xf32>
    %115 = arith.mulf %114, %25 : vector<1x128xf32>
    %116 = arith.addf %112, %115 : vector<1x128xf32>
    %c12 = arith.constant 12 : index
    %117 = memref.load %arg4[%c12] : memref<15xf32, #tpu.memory_space<smem>>
    %118 = vector.broadcast %117 : f32 to vector<1x128xf32>
    %119 = arith.mulf %118, %37 : vector<1x128xf32>
    %120 = arith.addf %116, %119 : vector<1x128xf32>
    %c13 = arith.constant 13 : index
    %121 = memref.load %arg4[%c13] : memref<15xf32, #tpu.memory_space<smem>>
    %122 = vector.broadcast %121 : f32 to vector<1x128xf32>
    %123 = arith.mulf %122, %49 : vector<1x128xf32>
    %124 = arith.addf %120, %123 : vector<1x128xf32>
    %c14 = arith.constant 14 : index
    %125 = memref.load %arg4[%c14] : memref<15xf32, #tpu.memory_space<smem>>
    %126 = vector.broadcast %125 : f32 to vector<1x128xf32>
    %127 = arith.mulf %126, %61 : vector<1x128xf32>
    %128 = arith.addf %124, %127 : vector<1x128xf32>
    %c2_27 = arith.constant 2 : index
    %129 = memref.load %arg5[%c2_27] : memref<3xf32, #tpu.memory_space<smem>>
    %130 = vector.broadcast %129 : f32 to vector<1x128xf32>
    %131 = arith.addf %128, %130 : vector<1x128xf32>
    %cst_28 = arith.constant 0.000000e+00 : f32
    %132 = vector.broadcast %cst_28 : f32 to vector<1x128xf32>
    %133 = arith.maximumf %131, %132 : vector<1x128xf32>
    %134 = tpu.concatenate %85, %109, %133 in 0 : vector<1x128xf32>, vector<1x128xf32>, vector<1x128xf32> -> vector<3x128xf32>
    %c0_29 = arith.constant 0 : index
    %c0_30 = arith.constant 0 : index
    %135 = vector.load %arg6[%c0_29, %c0_30] : memref<3x128xf32, #tpu.memory_space<vmem>>, vector<3x128xf32>
    tpu.vector_store %arg6[%c0_29, %c0_30], %134 {strides = array<i32>} : memref<3x128xf32, #tpu.memory_space<vmem>>, vector<3x128xf32>,
    return
  }
  func.func @transform_0(%arg0: i32) -> (i32, i32) {
    %c0_i32 = arith.constant 0 : i32
    %c0_i32_0 = arith.constant 0 : i32
    return %c0_i32, %arg0 : i32, i32
  }
  func.func @transform_1(%arg0: i32) -> i32 {
    %c0_i32 = arith.constant 0 : i32
    %c0_i32_0 = arith.constant 0 : i32
    return %c0_i32 : i32
  }
  func.func @transform_2(%arg0: i32) -> i32 {
    %c0_i32 = arith.constant 0 : i32
    %c0_i32_0 = arith.constant 0 : i32
    return %c0_i32 : i32
  }
  func.func @transform_3(%arg0: i32) -> i32 {
    %c0_i32 = arith.constant 0 : i32
    %c0_i32_0 = arith.constant 0 : i32
    return %c0_i32 : i32
  }
  func.func @transform_4(%arg0: i32) -> i32 {
    %c0_i32 = arith.constant 0 : i32
    %c0_i32_0 = arith.constant 0 : i32
    return %c0_i32 : i32
  }
  func.func @transform_5(%arg0: i32) -> (i32, i32) {
    %c0_i32 = arith.constant 0 : i32
    %c0_i32_0 = arith.constant 0 : i32
    return %c0_i32, %arg0 : i32, i32
  }
}

</mosaic_0001>

<bundles_post_ra>
// kernel: net_forward.1
= control target key start
LH: loop header
LB: loop body
LE: loop exit
PB: predicated region body
PF: predicated region fallthrough
CT: control target
= control target key end

     0   :  { %10 = vsyncpa [#allocation3], 0  ;;  %s432_s0 = inlined_call_operand.vmem [shape: f32[2,128], index: 0, kind: input, shape index: {}]   ;;  %s433_s1 = inlined_call_operand.vmem [shape: f32[10], index: 1, kind: input, shape index: {}]   ;;  %s434_s2 = inlined_call_operand.vmem [shape: f32[5], index: 2, kind: input, shape index: {}]   ;;  %s435_s3 = inlined_call_operand.vmem [shape: f32[15], index: 3, kind: input, shape index: {}]   ;;  %s436_s4 = inlined_call_operand.vmem [shape: f32[3], index: 4, kind: input, shape index: {}]   ;;  %s437_s5 = inlined_call_operand.vmem [shape: f32[3,128], index: 5, kind: output, shape index: {}]  }
   0x1   :  { %11 = vsyncpa [#allocation5], 0  ;;  %s31_s20 = sshll.u32 %s434_s2, 4  ;;  %s32_s20 = int_to_ptr.vmem [resolvable:$true] %s31_s20 }
   0x2   :  { %12 = vsyncpa [#allocation8], 0  ;;  %s21_s23 = sshll.u32 %s433_s1, 4  ;;  %s245_s24 = scalar_lea.vmem %s32_s20, 16  ;;  %s22_s23 = int_to_ptr.vmem [resolvable:$true] %s21_s23 }
   0x3   :  { %p246_p0 = scmp.ne.s32.totalorder %s32_s20, %s245_s24  ;;  %p250_p1 = scmp.lt.s32.totalorder %s32_s20, %s32_s20 }
   0x4   :  { %p251_p2 = scmp.lt.s32.totalorder %s245_s24, %s245_s24 }
   0x6   :  { %p252_p3 = por %p251_p2, %p250_p1 }
   0x8   :  { %p253_p4 = pnand %p252_p3, %p246_p0 }
   0xa   :  { %256 = shalt.err (!%p253_p4)
}
   0xb   :  { %s299_s25 = smov [#allocation4]   ;;  %s257_s26 = scalar_lea.vmem %s22_s23, 16 }
   0xc   :  { %34 = dma.vmem_to_smem %s32_s20, 16, %s299_s25, [#allocation5]  }
   0xd   :  { %p258_p5 = scmp.ne.s32.totalorder %s22_s23, %s257_s26  ;;  %p262_p6 = scmp.lt.s32.totalorder %s22_s23, %s22_s23 }
   0xe   :  { %p263_p7 = scmp.lt.s32.totalorder %s257_s26, %s257_s26 }
  0x10   :  { %p264_p8 = por %p263_p7, %p262_p6 }
  0x12   :  { %p265_p9 = pnand %p264_p8, %p258_p5 }
  0x14   :  { %268 = shalt.err (!%p265_p9)
}
  0x15   :  { %s300_s2 = smov [#allocation2]   ;;  %s41_s28 = sshll.u32 %s435_s3, 4  ;;  %s42_s28 = int_to_ptr.vmem [resolvable:$true] %s41_s28 }
  0x16   :  { %24 = dma.vmem_to_smem %s22_s23, 16, %s300_s2, [#allocation3]  }
  0x17   :  { %s51_s6 = sshll.u32 %s436_s4, 4  ;;  %s269_s7 = scalar_lea.vmem %s42_s28, 16  ;;  %s52_s6 = int_to_ptr.vmem [resolvable:$true] %s51_s6 }
  0x18   :  { %p270_p10 = scmp.ne.s32.totalorder %s42_s28, %s269_s7  ;;  %p274_p11 = scmp.lt.s32.totalorder %s42_s28, %s42_s28 }
  0x19   :  { %p275_p12 = scmp.lt.s32.totalorder %s269_s7, %s269_s7 }
  0x1b   :  { %p276_p13 = por %p275_p12, %p274_p11 }
  0x1d   :  { %p277_p0 = pnand %p276_p13, %p270_p10 }
  0x1f   :  { %280 = shalt.err (!%p277_p0)
}
  0x20   :  { %s301_s8 = smov [#allocation6]   ;;  %s281_s9 = scalar_lea.vmem %s52_s6, 16 }
  0x21   :  { %44 = dma.vmem_to_smem %s42_s28, 16, %s301_s8, [#allocation5]  }
  0x22   :  { %p282_p1 = scmp.ne.s32.totalorder %s52_s6, %s281_s9  ;;  %p286_p2 = scmp.lt.s32.totalorder %s52_s6, %s52_s6 }
  0x23   :  { %p287_p3 = scmp.lt.s32.totalorder %s281_s9, %s281_s9 }
  0x25   :  { %p288_p4 = por %p287_p3, %p286_p2 }
  0x27   :  { %p289_p5 = pnand %p288_p4, %p282_p1 }
  0x29   :  { %292 = shalt.err (!%p289_p5)
}
  0x2a   :  { %s302_s3 = smov [#allocation7]  }
  0x2b   :  { %54 = dma.vmem_to_smem %s52_s6, 16, %s302_s3, [#allocation8]  }
  0x2c   :  { %293 = dma.done.wait [#allocation3], 16  }
  0x2d   :  { %294 = vsyncadd [#allocation3], 4294967280 }
  0x2e   :  { %295 = dma.done.wait [#allocation5], 32  }
  0x2f   :  { %296 = vsyncadd [#allocation5], 4294967264 }
  0x30   :  { %297 = dma.done.wait [#allocation8], 16  }
  0x31   :  { %298 = vsyncadd [#allocation8], 4294967280 }
  0x32   :  { %67 = sfence }
  0x33   :  { %s70_s4 = sld [smem:[#allocation2]]  ;;  %s212_s10 = sld [smem:[#allocation2 + $0x1]]  ;;  %v68_v0 = vld [vmem:[%s432_s0] sm:$0x1]  ;;  %v69_v1 = vld [vmem:[%s432_s0 + $0x1] sm:$0x1] }
  0x34   :  { %s345_s11 = sld [smem:[#allocation4]]  ;;  %s213_s12 = sld [smem:[#allocation2 + $0x2]]  ;;  %vm200_vm0 = vcmask 1040384   ;;  %vm202_vm1 = vcmask 1041408  }
  0x35   :  { %s214_s13 = sld [smem:[#allocation2 + $0x3]]  ;;  %s347_s14 = sld [smem:[#allocation4 + $0x1]] }
  0x36   :  { %s216_s15 = sld [smem:[#allocation2 + $0x4]]  ;;  %s217_s18 = sld [smem:[#allocation2 + $0x5]] }
  0x37   :  { %s352_s19 = sld [smem:[#allocation4 + $0x2]]  ;;  %s357_s22 = sld [smem:[#allocation2 + $0x6]] }
  0x38   :  { %s359_s23 = sld [smem:[#allocation2 + $0x7]]  ;;  %s361_s24 = sld [smem:[#allocation4 + $0x3]] }
  0x39   :  { %v71_v2 = vstv %s70_s4  ;;  %s363_s25 = sld [smem:[#allocation2 + $0x8]]  ;;  %v74_v4 = vstv %s212_s10  ;;  %s365_s26 = sld [smem:[#allocation2 + $0x9]] }
  0x3a   :  { %v72_v3 = vmul.f32 %v71_v2, %v68_v0  ;;  %s367_s2 = sld [smem:[#allocation4 + $0x4]]  ;;  %v75_v5 = vmul.f32 %v74_v4, %v69_v1  ;;  %v78_v6 = vstv %s345_s11  ;;  %v82_v7 = vstv %s213_s12  ;;  %s370_s0 = sld [smem:[#allocation6]] }
  0x3b   :  { %v85_v8 = vstv %s214_s13  ;;  %s372_s1 = sld [smem:[#allocation6 + $0x1]]  ;;  %v83_v9 = vmul.f32 %v82_v7, %v68_v0  ;;  %v89_v11 = vstv %s347_s14  ;;  %s375_s27 = sld [smem:[#allocation6 + $0x2]] }
  0x3c   :  { %v86_v10 = vmul.f32 %v85_v8, %v69_v1  ;;  %v93_v12 = vstv %s216_s15  ;;  %s377_s28 = sld [smem:[#allocation6 + $0x3]]  ;;  %v76_v13 = vadd.f32 %v75_v5, %v72_v3  ;;  %v96_v15 = vstv %s217_s18  ;;  %s380_s29 = sld [smem:[#allocation6 + $0x4]] }
  0x3d   :  { %v94_v14 = vmul.f32 %v93_v12, %v68_v0  ;;  %v100_v16 = vstv %s352_s19  ;;  %v97_v18 = vmul.f32 %v96_v15, %v69_v1  ;;  %v104_v19 = vstv %s357_s22  ;;  %s384_s30 = sld [smem:[#allocation6 + $0x5]]  ;;  %s386_s6 = sld [smem:[#allocation6 + $0x6]] }
  0x3e   :  { %v87_v17 = vadd.f32 %v86_v10, %v83_v9  ;;  %v107_v20 = vstv %s359_s23  ;;  %v79_v21 = vadd.f32 %v78_v6, %v76_v13  ;;  %v105_v22 = vmul.f32 %v104_v19, %v68_v0  ;;  %s389_s7 = sld [smem:[#allocation6 + $0x7]]  ;;  %s393_s8 = sld [smem:[#allocation6 + $0x8]] }
  0x3f   :  { %v108_v23 = vmul.f32 %v107_v20, %v69_v1  ;;  %v111_v24 = vstv %s361_s24  ;;  %v98_v26 = vadd.f32 %v97_v18, %v94_v14  ;;  %v115_v27 = vstv %s363_s25  ;;  %s395_s9 = sld [smem:[#allocation6 + $0x9]]  ;;  %s399_s3 = sld [smem:[#allocation6 + $0xa]] }
  0x40   :  { %v90_v25 = vadd.f32 %v89_v11, %v87_v17  ;;  %v118_v28 = vstv %s365_s26  ;;  %v80_v29 = vmax.f32 %v79_v21, 0.0  ;;  %v116_v31 = vmul.f32 %v115_v27, %v68_v0  ;;  %s402_s4 = sld [smem:[#allocation6 + $0xb]]  ;;  %s404_s10 = sld [smem:[#allocation6 + $0xc]] }
  0x41   :  { %v109_v30 = vadd.f32 %v108_v23, %v105_v22  ;;  %v119_v32 = vmul.f32 %v118_v28, %v69_v1  ;;  %v101_v34 = vadd.f32 %v100_v16, %v98_v26  ;;  %v122_v35 = vstv %s367_s2  ;;  %s408_s11 = sld [smem:[#allocation6 + $0xd]]  ;;  %s411_s12 = sld [smem:[#allocation6 + $0xe]] }
  0x42   :  { %v91_v33 = vmax.f32 %v90_v25, 0.0  ;;  %v126_v36 = vstv %s370_s0  ;;  %v129_v40 = vstv %s372_s1  ;;  %v133_v43 = vstv %s375_s27  ;;  %s413_s13 = sld [smem:[#allocation7]]  ;;  %s417_s14 = sld [smem:[#allocation7 + $0x1]] }
  0x43   :  { %v112_v37 = vadd.f32 %v111_v24, %v109_v30  ;;  %v120_v38 = vadd.f32 %v119_v32, %v116_v31  ;;  %v127_v39 = vmul.f32 %v126_v36, %v80_v29  ;;  %v102_v41 = vmax.f32 %v101_v34, 0.0  ;;  %s240_s15 = sld [smem:[#allocation7 + $0x2]] }
  0x44   :  { %v130_v42 = vmul.f32 %v129_v40, %v91_v33  ;;  %v137_v44 = vstv %s377_s28  ;;  %v141_v47 = vstv %s380_s29  ;;  %v149_v50 = vstv %s384_s30 }
  0x45   :  { %v113_v45 = vmax.f32 %v112_v37, 0.0  ;;  %v123_v46 = vadd.f32 %v122_v35, %v120_v38  ;;  %v134_v49 = vmul.f32 %v133_v43, %v102_v41  ;;  %v152_v51 = vstv %s386_s6 }
  0x46   :  { %v131_v48 = vadd.f32 %v130_v42, %v127_v39  ;;  %v150_v54 = vmul.f32 %v149_v50, %v80_v29  ;;  %v153_v55 = vmul.f32 %v152_v51, %v91_v33  ;;  %v156_v57 = vstv %s389_s7 }
  0x47   :  { %v124_v52 = vmax.f32 %v123_v46, 0.0  ;;  %v138_v53 = vmul.f32 %v137_v44, %v113_v45  ;;  %v160_v58 = vstv %s393_s8  ;;  %v164_v59 = vstv %s395_s9 }
  0x48   :  { %v135_v56 = vadd.f32 %v134_v49, %v131_v48  ;;  %v154_v61 = vadd.f32 %v153_v55, %v150_v54  ;;  %v157_v62 = vmul.f32 %v156_v57, %v102_v41  ;;  %v161_v63 = vmul.f32 %v160_v58, %v113_v45 }
  0x49   :  { %v142_v60 = vmul.f32 %v141_v47, %v124_v52  ;;  %v165_v1 = vmul.f32 %v164_v59, %v124_v52  ;;  %v172_v2 = vstv %s399_s3  ;;  %v175_v5 = vstv %s402_s4 }
  0x4a   :  { %v139_v0 = vadd.f32 %v138_v53, %v135_v56  ;;  %v158_v3 = vadd.f32 %v157_v62, %v154_v61  ;;  %v173_v4 = vmul.f32 %v172_v2, %v80_v29  ;;  %v179_v6 = vstv %s404_s10 }
  0x4b   :  { %v176_v7 = vmul.f32 %v175_v5, %v91_v33  ;;  %v180_v8 = vmul.f32 %v179_v6, %v102_v41  ;;  %v183_v9 = vstv %s408_s11  ;;  %v187_v12 = vstv %s411_s12 }
  0x4c   :  { %v143_v10 = vadd.f32 %v142_v60, %v139_v0  ;;  %v162_v11 = vadd.f32 %v161_v63, %v158_v3  ;;  %v145_v13 = vstv %s413_s13  ;;  %v168_v14 = vstv %s417_s14 }
  0x4d   :  { %v177_v15 = vadd.f32 %v176_v7, %v173_v4  ;;  %v184_v16 = vmul.f32 %v183_v9, %v113_v45  ;;  %v188_v19 = vmul.f32 %v187_v12, %v124_v52  ;;  %v191_v24 = vstv %s240_s15 }
  0x4e   :  { %v166_v17 = vadd.f32 %v165_v1, %v162_v11  ;;  %v146_v20 = vadd.f32 %v145_v13, %v143_v10 }
  0x4f   :  { %v181_v18 = vadd.f32 %v180_v8, %v177_v15 }
  0x50   :  { %v169_v21 = vadd.f32 %v168_v14, %v166_v17  ;;  %v147_v26 = vmax.f32 %v146_v20, 0.0 }
  0x51   :  { %v185_v22 = vadd.f32 %v184_v16, %v181_v18 }
  0x52   :  { %v170_v23 = vmax.f32 %v169_v21, 0.0 }
  0x53   :  { %v189_v25 = vadd.f32 %v188_v19, %v185_v22 }
  0x54   :  { %v195_v27 = vrot.slane %v170_v23, 7 }
  0x55   :  { %v192_v28 = vadd.f32 %v191_v24, %v189_v25 }
  0x56   :  { %v201_v30 = vsel %vm200_vm0, %v147_v26, %v195_v27 }
  0x57   :  { %v193_v29 = vmax.f32 %v192_v28, 0.0 }
  0x59   :  { %v198_v31 = vrot.slane %v193_v29, 6 }
  0x5b   :  { %v203_v32 = vsel %vm202_vm1, %v201_v30, %v198_v31 }
  0x5c   :  { %204 = vst [vmem:[%s437_s5] sm:$0x7] %v203_v32 }
  0x5d   :  { %209 = vsyncpa [#allocation3], 1 }
  0x5e   :  { %210 = vsyncpa [#allocation5], 1 }
  0x5f   :  { %211 = vsyncpa [#allocation8], 1 }

</bundles_post_ra>
